<compile_context>
chip_gen: v6e
topology: v6e:2x2x1
jax: 0.10.0
libtpu: 0.0.40
codegen_flags: <defaults>
</compile_context>

<pallas_src>
import functools

import jax
import jax.numpy as jnp
from jax.experimental import pallas as pl
from jax.experimental.pallas import tpu as pltpu


def _round_up(x, m):
    return ((x + m - 1) // m) * m


# ---------------------------------------------------------------------------
# Kernels
# ---------------------------------------------------------------------------
def _swiglu_kernel_acc(x_ref, w12_ref, wp_ref, o_ref, acc_ref):
    """Variant with an f32 VMEM accumulator (used when out dtype != f32).

    x_ref:   (TM, D)      row tile of tokens
    w12_ref: (2, D, TH)   stacked [c_fc, c_fc2] weight slices, (in, out) layout
    wp_ref:  (TH, D)      c_proj weight slice, (in, out) layout
    o_ref:   (TM, D)      output row tile (resident across the H axis)
    acc_ref: (TM, D)      f32 accumulator scratch
    """
    h = pl.program_id(1)

    @pl.when(h == 0)
    def _():
        acc_ref[...] = jnp.zeros_like(acc_ref)

    x = x_ref[...]
    x1 = jnp.dot(x, w12_ref[0], preferred_element_type=jnp.float32)
    x2 = jnp.dot(x, w12_ref[1], preferred_element_type=jnp.float32)
    # SwiGLU gate, fused on the (TM, TH) hidden slice only.
    gated = x1 * (x2 * jax.nn.sigmoid(x2))
    acc_ref[...] += jnp.dot(gated.astype(wp_ref.dtype), wp_ref[...],
                            preferred_element_type=jnp.float32)

    @pl.when(h == pl.num_programs(1) - 1)
    def _():
        o_ref[...] = acc_ref[...].astype(o_ref.dtype)


def _swiglu_kernel_f32(x_ref, w12_ref, wp_ref, o_ref):
    """f32 output: accumulate directly into the resident output tile."""
    h = pl.program_id(1)

    @pl.when(h == 0)
    def _():
        o_ref[...] = jnp.zeros_like(o_ref)

    x = x_ref[...]
    x1 = jnp.dot(x, w12_ref[0], preferred_element_type=jnp.float32)
    x2 = jnp.dot(x, w12_ref[1], preferred_element_type=jnp.float32)
    gated = x1 * (x2 * jax.nn.sigmoid(x2))
    o_ref[...] += jnp.dot(gated.astype(wp_ref.dtype), wp_ref[...],
                          preferred_element_type=jnp.float32)


# ---------------------------------------------------------------------------
# Tiling helpers
# ---------------------------------------------------------------------------
def _vmem_budget_bytes():
    """Usable VMEM: physical capacity minus ~18% headroom for compiler scratch,
    semaphores and double-buffer slack.  Falls back to the smallest generation
    (v7x, 64 MiB per TC) if the query is unavailable."""
    try:
        cap = int(pltpu.get_tpu_info().vmem_capacity_bytes)
    except Exception:
        cap = 64 << 20
    return int(cap * 0.82)


def _pick_hidden_tile(h_pad, target):
    """Largest multiple-of-128 divisor of h_pad that is <= target (>= 128)."""
    target = max(128, min(target, h_pad))
    best = 128
    t = 128
    while t <= target:
        if h_pad % t == 0:
            best = t
        t += 128
    return best


def _shrink_hidden_tile(th):
    th //= 2
    if th < 128 or th % 128 != 0:
        th = 128
    return th


# ---------------------------------------------------------------------------
# Wrapper
# ---------------------------------------------------------------------------
@functools.partial(jax.jit, static_argnames=("tile_m", "tile_h"))
def swiglu_mlp(x, w_fc12_t, w_proj_t, *, tile_m=None, tile_h=None):
    """SwiGLU MLP forward.

    x:         (M, D)      tokens (batch*seq flattened on the row axis)
    w_fc12_t:  (2, D, H)   stacked [c_fc, c_fc2] weights, (in, out) layout
    w_proj_t:  (H, D)      c_proj weight, (in, out) layout
    """
    M, D = x.shape
    H = w_fc12_t.shape[2]

    x_bytes = jnp.dtype(x.dtype).itemsize
    w_bytes = jnp.dtype(w_fc12_t.dtype).itemsize
    o_dtype = x.dtype
    o_bytes = x_bytes
    use_acc_scratch = jnp.dtype(o_dtype) != jnp.dtype(jnp.float32)

    budget = _vmem_budget_bytes()
    big_vmem = budget >= (80 << 20)  # True on v5e/v6e (128 MiB), False on v7x

    # ---- generation-aware tile targets -----------------------------------
    # Arithmetic intensity of this kernel is ~TM flops per weight byte; the
    # roofline crossover on v6e/v7x is ~600-650, so target TM >= 512.
    if tile_m is None:
        tile_m = 1024 if big_vmem else 512
    if tile_h is None:
        tile_h = 512 if big_vmem else 256

    # ---- hidden-dim padding & hidden tile ---------------------------------
    h_pad = _round_up(H, 128)
    th = _pick_hidden_tile(h_pad, tile_h)

    # ---- row tile: sublane multiple of the activation dtype ---------------
    sub = max(8, 32 // x_bytes)            # 8 for f32, 16 for bf16, 32 for i8
    m_ceil = _round_up(M, sub)

    def _per_row_bytes(th_):
        return (2 * D * x_bytes                         # x tile (double-buf)
                + 2 * D * o_bytes                       # out tile (double-buf)
                + (4 * D if use_acc_scratch else 0)     # f32 accumulator
                + 3 * th_ * 4)                          # f32 x1/x2/gate slices

    def _weight_bytes(th_, nbuf):
        # two fc slices (stacked) + one proj slice, nbuf-deep pipelining
        return nbuf * 3 * D * th_ * w_bytes

    # Shrink TH until the weight tiles plus at least one minimal row tile fit
    # (fixes the old `th = H` fallback blow-up for hidden sizes like 11008).
    while th > 128 and budget - _weight_bytes(th, 2) < _per_row_bytes(th) * sub:
        th = _shrink_hidden_tile(th)

    avail = max(budget - _weight_bytes(th, 2), _per_row_bytes(th) * sub)
    tm_fit = max(sub, (avail // _per_row_bytes(th)) // sub * sub)
    tm = max(sub, min(tile_m, m_ceil, tm_fit) // sub * sub)

    mt = (M + tm - 1) // tm
    m_pad = mt * tm
    ht = h_pad // th
    grid = (mt, ht)                        # reduction (H) axis last

    # ---- pad operands ------------------------------------------------------
    # (Zero-padded rows / hidden units contribute exactly zero to the output.)
    if m_pad != M:
        x = jnp.pad(x, ((0, m_pad - M), (0, 0)))
    if h_pad != H:
        w_fc12_t = jnp.pad(w_fc12_t, ((0, 0), (0, 0), (0, h_pad - H)))
        w_proj_t = jnp.pad(w_proj_t, ((0, h_pad - H), (0, 0)))

    # ---- deeper weight prefetch when clearly DMA-bound and VMEM-rich ------
    w_spec_kwargs = {}
    if (big_vmem and tm <= 256 and ht >= 4
            and budget - _weight_bytes(th, 3) >= _per_row_bytes(th) * tm):
        w_spec_kwargs = dict(pipeline_mode=pl.Buffered(3))

    in_specs = [
        pl.BlockSpec((tm, D), lambda i, h: (i, 0)),                    # x rows
        pl.BlockSpec((2, D, th), lambda i, h: (0, 0, h), **w_spec_kwargs),
        pl.BlockSpec((th, D), lambda i, h: (h, 0), **w_spec_kwargs),
    ]
    out_spec = pl.BlockSpec((tm, D), lambda i, h: (i, 0))

    if use_acc_scratch:
        kernel = _swiglu_kernel_acc
        scratch = [pltpu.VMEM((tm, D), jnp.float32)]
    else:
        kernel = _swiglu_kernel_f32
        scratch = []

    # Honest cost estimate: padded flops, mt x weight re-reads.
    cost = pl.CostEstimate(
        flops=6 * m_pad * D * h_pad,
        transcendentals=m_pad * h_pad,
        bytes_accessed=(m_pad * D * x_bytes + m_pad * D * o_bytes
                        + mt * 3 * D * h_pad * w_bytes),
    )

    out = pl.pallas_call(
        kernel,
        out_shape=jax.ShapeDtypeStruct((m_pad, D), o_dtype),
        grid_spec=pltpu.PrefetchScalarGridSpec(
            num_scalar_prefetch=0,
            grid=grid,
            in_specs=in_specs,
            out_specs=out_spec,
            scratch_shapes=scratch,
        ),
        compiler_params=pltpu.CompilerParams(
            dimension_semantics=("parallel", "arbitrary"),
            vmem_limit_bytes=int(budget),
        ),
        cost_estimate=cost,
    )(x, w_fc12_t, w_proj_t)

    if m_pad != M:
        out = out[:M]
    return out


def _reference(x, w_fc, w_fc2, w_proj):
    x1 = x @ w_fc.T
    x2 = x @ w_fc2.T
    x2 = x2 * jax.nn.sigmoid(x2)
    return (x1 * x2) @ w_proj.T


def _run_case(key, n_embd, batch, seq, dtype, atol, rtol):
    hidden_dim = 4 * n_embd       # ffn_dim_multiplier=None, multiple_of=1
    kx, k1, k2, k3 = jax.random.split(key, 4)

    x = jax.random.normal(kx, (batch, seq, n_embd), jnp.float32)
    # PyTorch-layout "Linear" weights: (out_features, in_features).
    w_fc = jax.random.normal(k1, (hidden_dim, n_embd), jnp.float32) * 0.1
    w_fc2 = jax.random.normal(k2, (hidden_dim, n_embd), jnp.float32) * 0.1
    w_proj = jax.random.normal(k3, (n_embd, hidden_dim), jnp.float32) * 0.1

    x = x.astype(dtype)
    w_fc = w_fc.astype(dtype)
    w_fc2 = w_fc2.astype(dtype)
    w_proj = w_proj.astype(dtype)

    # One-time (offline) layout conversion: stacked (2, D, H) and (H, D).
    w_fc12_t = jnp.stack([w_fc.T, w_fc2.T])     # (2, D, H)
    w_proj_t = jnp.asarray(w_proj.T)            # (H, D)

    x2d = x.reshape(batch * seq, n_embd)
    out2d = swiglu_mlp(x2d, w_fc12_t, w_proj_t)
    out = out2d.reshape(batch, seq, n_embd)
    jax.block_until_ready(out)

    ref = _reference(x2d.astype(jnp.float32), w_fc.astype(jnp.float32),
                     w_fc2.astype(jnp.float32), w_proj.astype(jnp.float32))
    ref = ref.reshape(batch, seq, n_embd)

    assert out.shape == (batch, seq, n_embd)
    assert jnp.allclose(out.astype(jnp.float32), ref, atol=atol, rtol=rtol), (
        f"mismatch vs reference (n_embd={n_embd}, dtype={dtype})")


if __name__ == "__main__":
    key = jax.random.PRNGKey(0)
    k1, k2 = jax.random.split(key)

    # Case 1: n_embd=32 -> H=128 (tile-aligned), f32 path (accumulates
    # directly into the resident output tile, no scratch).
    _run_case(k1, n_embd=32, batch=2, seq=8, dtype=jnp.float32,
              atol=1e-4, rtol=1e-4)

    # Case 2: n_embd=48 -> H=192 (exercises hidden-dim padding to 256) and
    # seq=5 (ragged row count), bf16 path (f32 scratch accumulator).
    _run_case(k2, n_embd=48, batch=2, seq=5, dtype=jnp.bfloat16,
              atol=2e-2, rtol=2e-2)

    print("KERNEL_OK")
</pallas_src>

<mosaic_0001>
module attributes {stable_mosaic.version = 11 : i64} {
  func.func @_swiglu_kernel_f32(%arg0: i32, %arg1: i32, %arg2: memref<16x32xf32, #tpu.memory_space<vmem>>, %arg3: memref<2x32x128xf32, #tpu.memory_space<vmem>>, %arg4: memref<128x32xf32, #tpu.memory_space<vmem>>, %arg5: memref<16x32xf32, #tpu.memory_space<vmem>>) attributes {dimension_semantics = [#tpu.dimension_semantics<parallel>, #tpu.dimension_semantics<arbitrary>], iteration_bounds = array<i64: 1, 1>, scalar_prefetch = 0 : i64, scratch_operands = 0 : i64, tpu.core_type = #tpu.core_type<tc>, window_params = [{transform_indices = @transform_0, window_bounds = array<i64: 16, 32>}, {transform_indices = @transform_1, window_bounds = array<i64: 2, 32, 128>}, {transform_indices = @transform_2, window_bounds = array<i64: 128, 32>}, {transform_indices = @transform_3, window_bounds = array<i64: 16, 32>}]} {
    %c0_i32 = arith.constant 0 : i32
    %0 = arith.cmpi eq, %arg1, %c0_i32 : i32
    %1 = arith.extui %0 : i1 to i32
    %c0_i32_0 = arith.constant 0 : i32
    %2 = arith.cmpi ne, %1, %c0_i32_0 : i32
    scf.if %2 {
      %cst_16 = arith.constant 0.000000e+00 : f32
      %22 = vector.broadcast %cst_16 : f32 to vector<16x32xf32>
      %c0_17 = arith.constant 0 : index
      %c0_18 = arith.constant 0 : index
      %23 = vector.load %arg5[%c0_17, %c0_18] : memref<16x32xf32, #tpu.memory_space<vmem>>, vector<16x32xf32>
      tpu.vector_store %arg5[%c0_17, %c0_18], %22 {strides = array<i32>} : memref<16x32xf32, #tpu.memory_space<vmem>>, vector<16x32xf32>,
    } else {
    }
    %c0 = arith.constant 0 : index
    %c0_1 = arith.constant 0 : index
    %3 = vector.load %arg2[%c0, %c0_1] : memref<16x32xf32, #tpu.memory_space<vmem>>, vector<16x32xf32>
    %c0_2 = arith.constant 0 : index
    %c0_3 = arith.constant 0 : index
    %c0_4 = arith.constant 0 : index
    %4 = vector.load %arg3[%c0_2, %c0_3, %c0_4] : memref<2x32x128xf32, #tpu.memory_space<vmem>>, vector<1x32x128xf32>
    %5 = vector.shape_cast %4 : vector<1x32x128xf32> to vector<32x128xf32>
    %cst = arith.constant dense<0.000000e+00> : vector<16x128xf32>
    %6 = tpu.matmul %3, %5, %cst {dimension_numbers = #tpu.dot_dimension_numbers<[1], [0], [0], [1], [0, 0, 1, 1], [], []>} : vector<16x32xf32>, vector<32x128xf32>, vector<16x128xf32> -> vector<16x128xf32>
    %c1 = arith.constant 1 : index
    %c0_5 = arith.constant 0 : index
    %c0_6 = arith.constant 0 : index
    %7 = vector.load %arg3[%c1, %c0_5, %c0_6] : memref<2x32x128xf32, #tpu.memory_space<vmem>>, vector<1x32x128xf32>
    %8 = vector.shape_cast %7 : vector<1x32x128xf32> to vector<32x128xf32>
    %cst_7 = arith.constant dense<0.000000e+00> : vector<16x128xf32>
    %9 = tpu.matmul %3, %8, %cst_7 {dimension_numbers = #tpu.dot_dimension_numbers<[1], [0], [0], [1], [0, 0, 1, 1], [], []>} : vector<16x32xf32>, vector<32x128xf32>, vector<16x128xf32> -> vector<16x128xf32>
    %10 = arith.negf %9 : vector<16x128xf32>
    %11 = math.exp %10 : vector<16x128xf32>
    %cst_8 = arith.constant 1.000000e+00 : f32
    %12 = vector.broadcast %cst_8 : f32 to vector<16x128xf32>
    %13 = arith.addf %12, %11 : vector<16x128xf32>
    %14 = arith.divf %12, %13 : vector<16x128xf32>
    %15 = arith.mulf %9, %14 : vector<16x128xf32>
    %16 = arith.mulf %6, %15 : vector<16x128xf32>
    %c0_9 = arith.constant 0 : index
    %c0_10 = arith.constant 0 : index
    %17 = vector.load %arg5[%c0_9, %c0_10] : memref<16x32xf32, #tpu.memory_space<vmem>>, vector<16x32xf32>
    %c0_11 = arith.constant 0 : index
    %c0_12 = arith.constant 0 : index
    %18 = vector.load %arg4[%c0_11, %c0_12] : memref<128x32xf32, #tpu.memory_space<vmem>>, vector<128x32xf32>
    %cst_13 = arith.constant dense<0.000000e+00> : vector<16x32xf32>
    %19 = tpu.matmul %16, %18, %cst_13 {dimension_numbers = #tpu.dot_dimension_numbers<[1], [0], [0], [1], [0, 0, 1, 1], [], []>} : vector<16x128xf32>, vector<128x32xf32>, vector<16x32xf32> -> vector<16x32xf32>
    %20 = arith.addf %17, %19 : vector<16x32xf32>
    %c0_14 = arith.constant 0 : index
    %c0_15 = arith.constant 0 : index
    %21 = vector.load %arg5[%c0_14, %c0_15] : memref<16x32xf32, #tpu.memory_space<vmem>>, vector<16x32xf32>
    tpu.vector_store %arg5[%c0_14, %c0_15], %20 {strides = array<i32>} : memref<16x32xf32, #tpu.memory_space<vmem>>, vector<16x32xf32>,
    return
  }
  func.func @transform_0(%arg0: i32, %arg1: i32) -> (i32, i32) {
    %c0_i32 = arith.constant 0 : i32
    %c0_i32_0 = arith.constant 0 : i32
    return %arg0, %c0_i32 : i32, i32
  }
  func.func @transform_1(%arg0: i32, %arg1: i32) -> (i32, i32, i32) {
    %c0_i32 = arith.constant 0 : i32
    %c0_i32_0 = arith.constant 0 : i32
    %c0_i32_1 = arith.constant 0 : i32
    return %c0_i32, %c0_i32_0, %arg1 : i32, i32, i32
  }
  func.func @transform_2(%arg0: i32, %arg1: i32) -> (i32, i32) {
    %c0_i32 = arith.constant 0 : i32
    %c0_i32_0 = arith.constant 0 : i32
    return %arg1, %c0_i32 : i32, i32
  }
  func.func @transform_3(%arg0: i32, %arg1: i32) -> (i32, i32) {
    %c0_i32 = arith.constant 0 : i32
    %c0_i32_0 = arith.constant 0 : i32
    return %arg0, %c0_i32 : i32, i32
  }
}

</mosaic_0001>

<bundles_post_ra>
// kernel: swiglu_mlp.1
= control target key start
LH: loop header
LB: loop body
LE: loop exit
PB: predicated region body
PF: predicated region fallthrough
CT: control target
= control target key end

     0   :  { %vm19_vm0 = vcmask 261120   ;;  %s563_s0 = inlined_call_operand.vmem [shape: f32[16,32], index: 0, kind: input, shape index: {}]   ;;  %s564_s1 = inlined_call_operand.vmem [shape: f32[2,32,128], index: 1, kind: input, shape index: {}]   ;;  %s565_s2 = inlined_call_operand.vmem [shape: f32[128,32], index: 2, kind: input, shape index: {}]   ;;  %s566_s3 = inlined_call_operand.hbm [shape: f32[16,32], index: 3, kind: output, shape index: {}]  }
   0x1   :  { %v27_v0 = vld [vmem:[%s564_s1 + $0x18] sm:$0xff]  ;;  %v26_v1 = vld [vmem:[%s564_s1 + $0x10] sm:$0xff]  ;;  %v22_v2 = vld [vmem:[%s563_s0] sm:$0xff] }
   0x2   :  { %359 = vmatprep.subr.mxu1 %v27_v0  ;;  %v25_v3 = vld [vmem:[%s564_s1 + $0x8] sm:$0xff]  ;;  %367 = vmatprep.mubr.msk.f32.mxu1 %vm19_vm0, %v22_v2 }
   0x3   :  { %360 = vmatpush3.msra.mxu1 %v27_v0 }
   0x4   :  { %361 = vmatprep.subr.mxu1 %v26_v1 }
   0x5   :  { %8 = vsyncpa [#allocation3], 0  ;;  %362 = vmatpush3.msra.mxu1 %v26_v1  ;;  %v24_v4 = vld [vmem:[%s564_s1] sm:$0xff]  ;;  %v23_v5 = vld [vmem:[%s563_s0 + $0x8] sm:$0xff]  ;;  %v450_v26 = vmov 0.0  }
   0x6   :  { %363 = vmatprep.subr.mxu1 %v25_v3  ;;  %v324_v6 = vld [vmem:[%s564_s1 + $0x38] sm:$0xff]  ;;  %v323_v7 = vld [vmem:[%s564_s1 + $0x30] sm:$0xff]  ;;  %v322_v8 = vld [vmem:[%s564_s1 + $0x28] sm:$0xff]  ;;  %21 = vst.msk [vmem:[#allocation2 + $0x8] sm:$0xff] %vm19_vm0, %v450_v26 }
   0x7   :  { %364 = vmatpush3.msra.mxu1 %v25_v3  ;;  %v321_v9 = vld [vmem:[%s564_s1 + $0x20] sm:$0xff]  ;;  %v223_v10 = vld [vmem:[%s565_s2 + $0x78] sm:$0xff]  ;;  %v222_v11 = vld [vmem:[%s565_s2 + $0x70] sm:$0xff]  ;;  %20 = vst.msk [vmem:[#allocation2] sm:$0xff] %vm19_vm0, %v450_v26 }
   0x8   :  { %365 = vmatprep.subr.mxu1 %v24_v4  ;;  %381 = vmatprep.subr.mxu0 %v223_v10  ;;  %v221_v12 = vld [vmem:[%s565_s2 + $0x68] sm:$0xff]  ;;  %v220_v13 = vld [vmem:[%s565_s2 + $0x60] sm:$0xff]  ;;  %v219_v14 = vld [vmem:[%s565_s2 + $0x58] sm:$0xff] }
   0x9   :  { %366 = vmatpush3.msra.mxu1 %v24_v4  ;;  %382 = vmatpush3.msra.mxu0 %v223_v10  ;;  %v218_v15 = vld [vmem:[%s565_s2 + $0x50] sm:$0xff]  ;;  %v217_v16 = vld [vmem:[%s565_s2 + $0x48] sm:$0xff]  ;;  %v216_v17 = vld [vmem:[%s565_s2 + $0x40] sm:$0xff] }
   0xa   :  { %368 = vmatmul.mubr.msk.f32.vlgmr.msra.gmra.mxu1 %vm19_vm0, %v23_v5  ;;  %370 = vmatprep.subr.mxu1 %v324_v6  ;;  %v215_v18 = vld [vmem:[%s565_s2 + $0x38] sm:$0xff]  ;;  %v214_v19 = vld [vmem:[%s565_s2 + $0x30] sm:$0xff]  ;;  %v213_v20 = vld [vmem:[%s565_s2 + $0x28] sm:$0xff] }
   0xb   :  { %371 = vmatpush3.msra.mxu1 %v324_v6  ;;  %378 = vmatprep.mubr.msk.f32.mxu1 %vm19_vm0, %v22_v2  ;;  %v212_v21 = vld [vmem:[%s565_s2 + $0x20] sm:$0xff]  ;;  %v211_v22 = vld [vmem:[%s565_s2 + $0x18] sm:$0xff]  ;;  %v210_v23 = vld [vmem:[%s565_s2 + $0x10] sm:$0xff] }
   0xc   :  { %372 = vmatprep.subr.mxu1 %v323_v7  ;;  %383 = vmatprep.subr.mxu0 %v222_v11  ;;  %v209_v24 = vld [vmem:[%s565_s2 + $0x8] sm:$0xff]  ;;  %v208_v25 = vld [vmem:[%s565_s2] sm:$0xff]  ;;  %s451_s2 = smov [#allocation2]  }
   0xd   :  { %373 = vmatpush3.msra.mxu1 %v323_v7  ;;  %384 = vmatpush3.msra.mxu0 %v222_v11  ;;  %v207_v43 = vld [vmem:[#allocation2 + $0x8] sm:$0xff]  ;;  %s308_s7 = sshll.u32 %s451_s2, 4  ;;  %s309_s7 = int_to_ptr.vmem [resolvable:$true] %s308_s7 }
   0xe   :  { %374 = vmatprep.subr.mxu1 %v322_v8  ;;  %385 = vmatprep.subr.mxu0 %v221_v12  ;;  %v206_v45 = vld [vmem:[#allocation2] sm:$0xff]  ;;  %s428_s8 = scalar_lea.vmem %s309_s7, 256  ;;  %p433_p1 = scmp.lt.s32.totalorder %s309_s7, %s309_s7 }
   0xf   :  { %375 = vmatpush3.msra.mxu1 %v322_v8  ;;  %386 = vmatpush3.msra.mxu0 %v221_v12  ;;  %p429_p0 = scmp.ne.s32.totalorder %s309_s7, %s428_s8  ;;  %p434_p2 = scmp.lt.s32.totalorder %s428_s8, %s428_s8 }
  0x10   :  { %376 = vmatprep.subr.mxu1 %v321_v9  ;;  %387 = vmatprep.subr.mxu0 %v220_v13 }
  0x11   :  { %377 = vmatpush3.msra.mxu1 %v321_v9  ;;  %388 = vmatpush3.msra.mxu0 %v220_v13  ;;  %p435_p3 = por %p434_p2, %p433_p1 }
  0x12   :  { %379 = vmatmul.mubr.msk.f32.vlgmr.msra.gmra.mxu1 %vm19_vm0, %v23_v5  ;;  %389 = vmatprep.subr.mxu0 %v219_v14 }
  0x13   :  { %390 = vmatpush3.msra.mxu0 %v219_v14  ;;  %p436_p4 = pnand %p435_p3, %p429_p0 }
  0x14   :  { %391 = vmatprep.subr.mxu0 %v218_v15 }
  0x15   :  { %392 = vmatpush3.msra.mxu0 %v218_v15 }
  0x16   :  { %393 = vmatprep.subr.mxu0 %v217_v16 }
  0x17   :  { %394 = vmatpush3.msra.mxu0 %v217_v16 }
  0x18   :  { %395 = vmatprep.subr.mxu0 %v216_v17 }
  0x19   :  { %396 = vmatpush3.msra.mxu0 %v216_v17 }
  0x1a   :  { %397 = vmatprep.subr.mxu0 %v215_v18 }
  0x1b   :  { %398 = vmatpush3.msra.mxu0 %v215_v18 }
  0x1c   :  { %399 = vmatprep.subr.mxu0 %v214_v19 }
  0x1d   :  { %400 = vmatpush3.msra.mxu0 %v214_v19 }
  0x1e   :  { %401 = vmatprep.subr.mxu0 %v213_v20 }
  0x1f   :  { %402 = vmatpush3.msra.mxu0 %v213_v20 }
  0x20   :  { %403 = vmatprep.subr.mxu0 %v212_v21 }
  0x21   :  { %404 = vmatpush3.msra.mxu0 %v212_v21 }
  0x22   :  { %405 = vmatprep.subr.mxu0 %v211_v22 }
  0x23   :  { %406 = vmatpush3.msra.mxu0 %v211_v22 }
  0x24   :  { %407 = vmatprep.subr.mxu0 %v210_v23 }
  0x25   :  { %408 = vmatpush3.msra.mxu0 %v210_v23 }
  0x26   :  { %409 = vmatprep.subr.mxu0 %v209_v24 }
  0x27   :  { %410 = vmatpush3.msra.mxu0 %v209_v24 }
  0x28   :  { %411 = vmatprep.subr.mxu0 %v208_v25 }
  0x29   :  { %412 = vmatpush3.msra.mxu0 %v208_v25 }
  0xca   :  { %v369_v27 = vpop.f32.mrf.mxu1 }
  0xcc   :  { %v101_v28 = vpop.f32.mrf.mxu1 }
  0xd2   :  { %v380_v29 = vpop.f32.mrf.mxu1 }
  0xd3   :  { %v328_v30 = vmul.f32 -1.442695, %v380_v29 }
  0xd4   :  { %v181_v31 = vpop.f32.mrf.mxu1 }
  0xd5   :  { %420 = vpow2.f32 %v328_v30  ;;  %v327_v32 = vmul.f32 -1.442695, %v181_v31 }
  0xd7   :  { %422 = vpow2.f32 %v327_v32 }
  0xe2   :  { %v421_v33 = vpop.eup %420 }
  0xe3   :  { %v197_v34 = vadd.f32 1.0, %v421_v33 }
  0xe4   :  { %v423_v35 = vpop.eup %422 }
  0xe5   :  { %424 = vrcp.f32 %v197_v34  ;;  %v196_v36 = vadd.f32 1.0, %v423_v35 }
  0xe7   :  { %426 = vrcp.f32 %v196_v36 }
  0xf2   :  { %v425_v37 = vpop.eup %424 }
  0xf3   :  { %v203_v39 = vmul.f32 %v425_v37, %v380_v29 }
  0xf4   :  { %v427_v38 = vpop.eup %426 }
  0xf5   :  { %v202_v40 = vmul.f32 %v427_v38, %v181_v31  ;;  %v205_v42 = vmul.f32 %v369_v27, %v203_v39 }
  0xf7   :  { %v204_v41 = vmul.f32 %v202_v40, %v101_v28 }
  0xf9   :  { %413 = vmatprep.mubr.f32.mxu0 %v204_v41 }
  0xfa   :  { %414 = vmatmul.mubr.f32.vlgmr.msra.gmra.mxu0 %v205_v42 }
 0x1ba   :  { %v415_v44 = vpop.f32.mrf.mxu0 }
 0x1bb   :  { %v300_v46 = vadd.f32 %v415_v44, %v207_v43 }
 0x1bc   :  { %v290_v47 = vpop.f32.mrf.mxu0 }
 0x1bd   :  { %302 = vst.msk [vmem:[#allocation2 + $0x8] sm:$0xff] %vm19_vm0, %v300_v46  ;;  %v299_v48 = vadd.f32 %v290_v47, %v206_v45 }
 0x1bf   :  { %301 = vst.msk [vmem:[#allocation2] sm:$0xff] %vm19_vm0, %v299_v48 }
 0x1c0   :  { %439 = shalt.err (!%p436_p4)
}
 0x1c1   :  { %s452_s1 = smov 128   ;;  %s453_s9 = smov 8  }
 0x1c2   :  { %314 = dma.vmem_to_hbm [thread:$0]  %s309_s7, 256, %s566_s3, [#allocation3], %s452_s1, %s452_s1, %s453_s9  }
 0x1c3   :  { %448 = dma.done.wait [#allocation3], 256  }
 0x1c4   :  { %449 = vsyncadd [#allocation3], 4294967040 }
 0x1c5   :  { %318 = vsyncpa [#allocation3], 1 }

</bundles_post_ra>
